<compile_context>
chip_gen: v6e
topology: v6e:2x2x1
jax: 0.10.0
libtpu: 0.0.40
codegen_flags: <defaults>
</compile_context>

<pallas_src>
import math

import jax
import jax.numpy as jnp
from jax.experimental import pallas as pl
from jax.experimental.pallas import tpu as pltpu


def _gcn_rpd_kernel(x_ref, rpd_ref, lm_ref, w1_ref, b1_ref, w2_ref, b2_ref, out_ref):
    tb, n, d = x_ref.shape
    tbn = tb * n

    rpd = rpd_ref[...]                                   # (TB, N, N) f32
    lm = lm_ref[...]                                     # (TB, N, 2) f32
    inv = pl.reciprocal(lm[:, :, 0:1], approx=True)      # 1/length, (TB, N, 1), EUP
    msk = lm[:, :, 1:2]                                  # (TB, N, 1)

    def layer(h3, w_ref, b_ref):
        # Weight matmul on the MXU: one (TB*N, D) @ (D, D) matmul, low-precision
        # inputs (w_ref.dtype, typically bf16), f32 accumulation.  For f32 h3 with
        # N % 8 == 0 the 3D<->2D reshapes are tile-aligned (no relayout).
        hw = jnp.dot(h3.reshape(tbn, d).astype(w_ref.dtype), w_ref[...],
                     preferred_element_type=jnp.float32).reshape(tb, n, d)
        if n <= 16:
            # Adjacency aggregation as an unrolled f32 VPU MAC over the node dim.
            agg = rpd[:, :, 0:1] * hw[:, 0:1, :]
            for m in range(1, n):
                agg = agg + rpd[:, :, m:m + 1] * hw[:, m:m + 1, :]
        else:
            # Large-N fallback: batched MXU contraction.
            agg = jnp.einsum('bnm,bmd->bnd', rpd.astype(w_ref.dtype),
                             hw.astype(w_ref.dtype),
                             preferred_element_type=jnp.float32)
        return jnp.maximum(agg * inv + b_ref[...], 0.0)

    h1 = layer(x_ref[...], w1_ref, b1_ref)               # GraphConvolution 1 + ReLU
    h2 = layer(h1, w2_ref, b2_ref)                       # GraphConvolution 2 + ReLU
    # Final store; when the out block is (TB, 1, N*D) this is a lane-dense unmasked
    # store, otherwise a direct (TB, N, D) store.
    out_ref[...] = (h2 * msk).reshape(out_ref.shape).astype(out_ref.dtype)


def _padded_block_bytes(shape, dtype):
    """Rough padded VMEM footprint of one block (lanes to 128, sublanes to the tile)."""
    itemsize = jnp.dtype(dtype).itemsize
    dims = list(shape)
    if len(dims) == 1:
        dims = [1] + dims
    sub = 8 * max(1, 4 // itemsize)          # 8 (f32) / 16 (bf16) / 32 (int8)
    dims[-1] = pl.cdiv(dims[-1], 128) * 128
    dims[-2] = pl.cdiv(dims[-2], sub) * sub
    total = itemsize
    for v in dims:
        total *= v
    return total


def gcn_rpd_forward(lstm_feature, wpp, length, mask, w1, b1, w2, b2,
                    *, block_b=None, compute_dtype=jnp.bfloat16,
                    out_dtype=jnp.float32):
    """Pallas implementation of GCNModel_rpd.forward.

    lstm_feature: (B, N, D) float32
    wpp (rpd):    (B, N, N) float32
    length:       (B, N, 1) or (B, N) float32 denominator
    mask:         (B, N)    float32/int mask
    compute_dtype: dtype fed to the MXU weight matmuls (f32 accumulation regardless).
    out_dtype:     output dtype (f32 preserves the PyTorch semantics; bf16 halves
                   the HBM writeback if the consumer tolerates it).
    """
    B, N, D = lstm_feature.shape

    # Inputs stay f32 in HBM (cast to bf16 happens in-kernel, hidden under DMA).
    x = jnp.asarray(lstm_feature, jnp.float32)
    rpd = jnp.asarray(wpp, jnp.float32)
    length3 = jnp.asarray(length, jnp.float32).reshape(B, N, 1)
    mask3 = jnp.asarray(mask, jnp.float32).reshape(B, N, 1)
    lm = jnp.concatenate([length3, mask3], axis=-1)       # (B, N, 2): [length | mask]
    w1c = jnp.asarray(w1, compute_dtype)                  # weights are tiny; cast here
    w2c = jnp.asarray(w2, compute_dtype)
    b1r = jnp.asarray(b1, jnp.float32).reshape(1, D)
    b2r = jnp.asarray(b2, jnp.float32).reshape(1, D)

    # Lane-dense output presentation when N*D is a multiple of 128.
    lane_dense = (N * D) % 128 == 0 and (N * D) >= 128
    out_arr_shape = (B, 1, N * D) if lane_dense else (B, N, D)

    # Generation-aware VMEM budget (v7x: 64 MiB physical, v5e/v6e: 128 MiB).
    try:
        phys_vmem = int(pltpu.get_tpu_info().vmem_capacity_bytes)
    except Exception:
        phys_vmem = 64 << 20          # safe lower bound (v7x per-core VMEM)
    vmem_limit = int(min(phys_vmem, max(24 << 20, int(0.75 * phys_vmem))))

    # Per-batch-element padded VMEM bytes of one set of blocks (block_b == 1).
    out_elem_shape = (1, 1, N * D) if lane_dense else (1, N, D)
    per_elem = (_padded_block_bytes((1, N, D), jnp.float32)       # x block
                + _padded_block_bytes((1, N, N), jnp.float32)     # rpd block
                + _padded_block_bytes((1, N, 2), jnp.float32)     # length/mask block
                + _padded_block_bytes(out_elem_shape, jnp.float32))  # out block
    # Rough bound for kernel-internal live temporaries (hw/agg/h1/h2 + bf16 copies).
    per_elem_tmp = 8 * _padded_block_bytes((1, N, D), jnp.float32)
    wt_bytes = (2 * _padded_block_bytes((D, D), compute_dtype)
                + 2 * _padded_block_bytes((1, D), jnp.float32))

    if block_b is None:
        budget = int(0.8 * vmem_limit) - 2 * wt_bytes - (2 << 20)
        denom_bytes = 2 * per_elem + per_elem_tmp         # double-buffered blocks + temps
        # Keep >= 2 grid steps on the parallel axis (v7x megacore); cap at 256.
        block_b = int(max(1, min(budget // denom_bytes, pl.cdiv(B, 2), 256)))
    block_b = int(max(1, min(block_b, B)))

    # cdiv grid: a partial last block (B % block_b != 0) is handled by Pallas'
    # boundary masking — garbage reads stay in their own (padded) batch rows and the
    # corresponding output rows are never written.
    grid = (pl.cdiv(B, block_b),)

    out_block = (block_b, 1, N * D) if lane_dense else (block_b, N, D)

    grid_spec = pltpu.PrefetchScalarGridSpec(
        num_scalar_prefetch=0,
        grid=grid,
        in_specs=[
            pl.BlockSpec((block_b, N, D), lambda b: (b, 0, 0)),   # lstm_feature (f32)
            pl.BlockSpec((block_b, N, N), lambda b: (b, 0, 0)),   # rpd (f32)
            pl.BlockSpec((block_b, N, 2), lambda b: (b, 0, 0)),   # [length | mask] (f32)
            pl.BlockSpec((D, D), lambda b: (0, 0)),               # W1
            pl.BlockSpec((1, D), lambda b: (0, 0)),               # b1
            pl.BlockSpec((D, D), lambda b: (0, 0)),               # W2
            pl.BlockSpec((1, D), lambda b: (0, 0)),               # b2
        ],
        out_specs=pl.BlockSpec(out_block, lambda b: (b, 0, 0)),
    )

    out = pl.pallas_call(
        _gcn_rpd_kernel,
        out_shape=jax.ShapeDtypeStruct(out_arr_shape, out_dtype),
        grid_spec=grid_spec,
        compiler_params=pltpu.CompilerParams(
            dimension_semantics=("parallel",),
            vmem_limit_bytes=vmem_limit),
    )(x, rpd, lm, w1c, b1r, w2c, b2r)

    if lane_dense:
        out = out.reshape(B, N, D)                        # free (metadata only) in HBM
    return out

    # TODO(synk): optional further packing for fixed D=32 — place 4 batch elements
    # along lanes (block-diagonal 128x128 weights) if profiling shows the weight
    # matmul / lane occupancy is still the binding slot after the changes above.


def gcn_rpd_reference(lstm_feature, wpp, length, mask, w1, b1, w2, b2):
    """Pure-JAX f32 reference matching the PyTorch module semantics."""
    B, N, D = lstm_feature.shape
    denom = jnp.asarray(length, jnp.float32).reshape(B, N, 1)
    h = jnp.matmul(lstm_feature, w1)
    h = jnp.matmul(wpp, h) / denom
    h = jax.nn.relu(h + b1)
    h2 = jnp.matmul(h, w2)
    h2 = jnp.matmul(wpp, h2) / denom
    h2 = jax.nn.relu(h2 + b2)
    return h2 * jnp.asarray(mask, jnp.float32).reshape(B, N, 1)


def _run_case(key, B, N, D, block_b=None):
    k_x, k_rpd, k_len, k_mask, k_w1, k_b1, k_w2, k_b2 = jax.random.split(key, 8)

    lstm_feature = jax.random.normal(k_x, (B, N, D), dtype=jnp.float32)
    wpp = jax.random.uniform(k_rpd, (B, N, N), dtype=jnp.float32)
    length = jax.random.uniform(k_len, (B, N, 1), dtype=jnp.float32,
                                minval=1.0, maxval=float(N))
    mask = (jax.random.uniform(k_mask, (B, N)) > 0.3).astype(jnp.float32)

    # GraphConvolution init: uniform(-stdv, stdv), stdv = 1/sqrt(out_features).
    stdv = 1.0 / math.sqrt(D)
    w1 = jax.random.uniform(k_w1, (D, D), minval=-stdv, maxval=stdv, dtype=jnp.float32)
    b1 = jax.random.uniform(k_b1, (D,), minval=-stdv, maxval=stdv, dtype=jnp.float32)
    w2 = jax.random.uniform(k_w2, (D, D), minval=-stdv, maxval=stdv, dtype=jnp.float32)
    b2 = jax.random.uniform(k_b2, (D,), minval=-stdv, maxval=stdv, dtype=jnp.float32)

    out = gcn_rpd_forward(lstm_feature, wpp, length, mask, w1, b1, w2, b2,
                          block_b=block_b)
    out = jax.block_until_ready(out)
    assert out.shape == (B, N, D)

    ref = gcn_rpd_reference(lstm_feature, wpp, length, mask, w1, b1, w2, b2)
    # bf16 MXU inputs + approximate EUP reciprocal vs exact f32 reference.
    assert jnp.allclose(out, ref, atol=5e-2, rtol=5e-2), "mismatch vs f32 reference"
    return out


if __name__ == "__main__":
    # Shapes consistent with the module: lstm_dim=16 -> D = 2*lstm_dim = 32.
    key = jax.random.PRNGKey(0)
    k0, k1 = jax.random.split(key)

    # Primary small case.
    _run_case(k0, B=2, N=8, D=32)
    # Exercise batch packing (block_b > 1) and a non-divisible grid boundary.
    _run_case(k1, B=5, N=8, D=32)

    print("KERNEL_OK")
</pallas_src>

<mosaic_0001>
module attributes {stable_mosaic.version = 11 : i64} {
  func.func @_gcn_rpd_kernel(%arg0: i32, %arg1: memref<1x8x32xf32, #tpu.memory_space<vmem>>, %arg2: memref<1x8x8xf32, #tpu.memory_space<vmem>>, %arg3: memref<1x8x2xf32, #tpu.memory_space<vmem>>, %arg4: memref<32x32xbf16, #tpu.memory_space<vmem>>, %arg5: memref<1x32xf32, #tpu.memory_space<vmem>>, %arg6: memref<32x32xbf16, #tpu.memory_space<vmem>>, %arg7: memref<1x32xf32, #tpu.memory_space<vmem>>, %arg8: memref<1x1x256xf32, #tpu.memory_space<vmem>>) attributes {dimension_semantics = [#tpu.dimension_semantics<parallel>], iteration_bounds = array<i64: 2>, scalar_prefetch = 0 : i64, scratch_operands = 0 : i64, tpu.core_type = #tpu.core_type<tc>, window_params = [{transform_indices = @transform_0, window_bounds = array<i64: 1, 8, 32>}, {transform_indices = @transform_1, window_bounds = array<i64: 1, 8, 8>}, {transform_indices = @transform_2, window_bounds = array<i64: 1, 8, 2>}, {pipeline_mode = #tpu.pipeline_mode<synchronous>, transform_indices = @transform_3, window_bounds = array<i64: 32, 32>}, {pipeline_mode = #tpu.pipeline_mode<synchronous>, transform_indices = @transform_4, window_bounds = array<i64: 1, 32>}, {pipeline_mode = #tpu.pipeline_mode<synchronous>, transform_indices = @transform_5, window_bounds = array<i64: 32, 32>}, {pipeline_mode = #tpu.pipeline_mode<synchronous>, transform_indices = @transform_6, window_bounds = array<i64: 1, 32>}, {transform_indices = @transform_7, window_bounds = array<i64: 1, 1, 256>}]} {
    %c0 = arith.constant 0 : index
    %c0_0 = arith.constant 0 : index
    %c0_1 = arith.constant 0 : index
    %0 = vector.load %arg2[%c0, %c0_0, %c0_1] : memref<1x8x8xf32, #tpu.memory_space<vmem>>, vector<1x8x8xf32>
    %c0_2 = arith.constant 0 : index
    %c0_3 = arith.constant 0 : index
    %c0_4 = arith.constant 0 : index
    %1 = vector.load %arg3[%c0_2, %c0_3, %c0_4] : memref<1x8x2xf32, #tpu.memory_space<vmem>>, vector<1x8x2xf32>
    %2 = vector.extract_strided_slice %1 {offsets = [0, 0, 0], sizes = [1, 8, 1], strides = [1, 1, 1]} : vector<1x8x2xf32> to vector<1x8x1xf32>
    %3 = tpu.reciprocal %2 {approx = true} : vector<1x8x1xf32> -> vector<1x8x1xf32>
    %4 = vector.extract_strided_slice %1 {offsets = [0, 0, 1], sizes = [1, 8, 1], strides = [1, 1, 1]} : vector<1x8x2xf32> to vector<1x8x1xf32>
    %c0_5 = arith.constant 0 : index
    %c0_6 = arith.constant 0 : index
    %c0_7 = arith.constant 0 : index
    %5 = vector.load %arg1[%c0_5, %c0_6, %c0_7] : memref<1x8x32xf32, #tpu.memory_space<vmem>>, vector<1x8x32xf32>
    %6 = vector.shape_cast %5 : vector<1x8x32xf32> to vector<8x32xf32>
    %7 = arith.truncf %6 : vector<8x32xf32> to vector<8x32xbf16>
    %c0_8 = arith.constant 0 : index
    %c0_9 = arith.constant 0 : index
    %8 = vector.load %arg4[%c0_8, %c0_9] : memref<32x32xbf16, #tpu.memory_space<vmem>>, vector<32x32xbf16>
    %cst = arith.constant dense<0.000000e+00> : vector<8x32xf32>
    %9 = tpu.matmul %7, %8, %cst {dimension_numbers = #tpu.dot_dimension_numbers<[1], [0], [0], [1], [0, 0, 1, 1], [], []>} : vector<8x32xbf16>, vector<32x32xbf16>, vector<8x32xf32> -> vector<8x32xf32>
    %10 = vector.shape_cast %9 : vector<8x32xf32> to vector<1x8x32xf32>
    %11 = vector.extract_strided_slice %0 {offsets = [0, 0, 0], sizes = [1, 8, 1], strides = [1, 1, 1]} : vector<1x8x8xf32> to vector<1x8x1xf32>
    %12 = vector.extract_strided_slice %10 {offsets = [0, 0, 0], sizes = [1, 1, 32], strides = [1, 1, 1]} : vector<1x8x32xf32> to vector<1x1x32xf32>
    %13 = vector.broadcast %11 : vector<1x8x1xf32> to vector<1x8x32xf32>
    %14 = vector.broadcast %12 : vector<1x1x32xf32> to vector<1x8x32xf32>
    %15 = arith.mulf %13, %14 : vector<1x8x32xf32>
    %16 = vector.extract_strided_slice %0 {offsets = [0, 0, 1], sizes = [1, 8, 1], strides = [1, 1, 1]} : vector<1x8x8xf32> to vector<1x8x1xf32>
    %17 = vector.extract_strided_slice %10 {offsets = [0, 1, 0], sizes = [1, 1, 32], strides = [1, 1, 1]} : vector<1x8x32xf32> to vector<1x1x32xf32>
    %18 = vector.broadcast %16 : vector<1x8x1xf32> to vector<1x8x32xf32>
    %19 = vector.broadcast %17 : vector<1x1x32xf32> to vector<1x8x32xf32>
    %20 = arith.mulf %18, %19 : vector<1x8x32xf32>
    %21 = arith.addf %15, %20 : vector<1x8x32xf32>
    %22 = vector.extract_strided_slice %0 {offsets = [0, 0, 2], sizes = [1, 8, 1], strides = [1, 1, 1]} : vector<1x8x8xf32> to vector<1x8x1xf32>
    %23 = vector.extract_strided_slice %10 {offsets = [0, 2, 0], sizes = [1, 1, 32], strides = [1, 1, 1]} : vector<1x8x32xf32> to vector<1x1x32xf32>
    %24 = vector.broadcast %22 : vector<1x8x1xf32> to vector<1x8x32xf32>
    %25 = vector.broadcast %23 : vector<1x1x32xf32> to vector<1x8x32xf32>
    %26 = arith.mulf %24, %25 : vector<1x8x32xf32>
    %27 = arith.addf %21, %26 : vector<1x8x32xf32>
    %28 = vector.extract_strided_slice %0 {offsets = [0, 0, 3], sizes = [1, 8, 1], strides = [1, 1, 1]} : vector<1x8x8xf32> to vector<1x8x1xf32>
    %29 = vector.extract_strided_slice %10 {offsets = [0, 3, 0], sizes = [1, 1, 32], strides = [1, 1, 1]} : vector<1x8x32xf32> to vector<1x1x32xf32>
    %30 = vector.broadcast %28 : vector<1x8x1xf32> to vector<1x8x32xf32>
    %31 = vector.broadcast %29 : vector<1x1x32xf32> to vector<1x8x32xf32>
    %32 = arith.mulf %30, %31 : vector<1x8x32xf32>
    %33 = arith.addf %27, %32 : vector<1x8x32xf32>
    %34 = vector.extract_strided_slice %0 {offsets = [0, 0, 4], sizes = [1, 8, 1], strides = [1, 1, 1]} : vector<1x8x8xf32> to vector<1x8x1xf32>
    %35 = vector.extract_strided_slice %10 {offsets = [0, 4, 0], sizes = [1, 1, 32], strides = [1, 1, 1]} : vector<1x8x32xf32> to vector<1x1x32xf32>
    %36 = vector.broadcast %34 : vector<1x8x1xf32> to vector<1x8x32xf32>
    %37 = vector.broadcast %35 : vector<1x1x32xf32> to vector<1x8x32xf32>
    %38 = arith.mulf %36, %37 : vector<1x8x32xf32>
    %39 = arith.addf %33, %38 : vector<1x8x32xf32>
    %40 = vector.extract_strided_slice %0 {offsets = [0, 0, 5], sizes = [1, 8, 1], strides = [1, 1, 1]} : vector<1x8x8xf32> to vector<1x8x1xf32>
    %41 = vector.extract_strided_slice %10 {offsets = [0, 5, 0], sizes = [1, 1, 32], strides = [1, 1, 1]} : vector<1x8x32xf32> to vector<1x1x32xf32>
    %42 = vector.broadcast %40 : vector<1x8x1xf32> to vector<1x8x32xf32>
    %43 = vector.broadcast %41 : vector<1x1x32xf32> to vector<1x8x32xf32>
    %44 = arith.mulf %42, %43 : vector<1x8x32xf32>
    %45 = arith.addf %39, %44 : vector<1x8x32xf32>
    %46 = vector.extract_strided_slice %0 {offsets = [0, 0, 6], sizes = [1, 8, 1], strides = [1, 1, 1]} : vector<1x8x8xf32> to vector<1x8x1xf32>
    %47 = vector.extract_strided_slice %10 {offsets = [0, 6, 0], sizes = [1, 1, 32], strides = [1, 1, 1]} : vector<1x8x32xf32> to vector<1x1x32xf32>
    %48 = vector.broadcast %46 : vector<1x8x1xf32> to vector<1x8x32xf32>
    %49 = vector.broadcast %47 : vector<1x1x32xf32> to vector<1x8x32xf32>
    %50 = arith.mulf %48, %49 : vector<1x8x32xf32>
    %51 = arith.addf %45, %50 : vector<1x8x32xf32>
    %52 = vector.extract_strided_slice %0 {offsets = [0, 0, 7], sizes = [1, 8, 1], strides = [1, 1, 1]} : vector<1x8x8xf32> to vector<1x8x1xf32>
    %53 = vector.extract_strided_slice %10 {offsets = [0, 7, 0], sizes = [1, 1, 32], strides = [1, 1, 1]} : vector<1x8x32xf32> to vector<1x1x32xf32>
    %54 = vector.broadcast %52 : vector<1x8x1xf32> to vector<1x8x32xf32>
    %55 = vector.broadcast %53 : vector<1x1x32xf32> to vector<1x8x32xf32>
    %56 = arith.mulf %54, %55 : vector<1x8x32xf32>
    %57 = arith.addf %51, %56 : vector<1x8x32xf32>
    %58 = vector.broadcast %3 : vector<1x8x1xf32> to vector<1x8x32xf32>
    %59 = arith.mulf %57, %58 : vector<1x8x32xf32>
    %c0_10 = arith.constant 0 : index
    %c0_11 = arith.constant 0 : index
    %60 = vector.load %arg5[%c0_10, %c0_11] : memref<1x32xf32, #tpu.memory_space<vmem>>, vector<1x32xf32>
    %61 = vector.shape_cast %60 : vector<1x32xf32> to vector<1x1x32xf32>
    %62 = vector.broadcast %61 : vector<1x1x32xf32> to vector<1x8x32xf32>
    %63 = arith.addf %59, %62 : vector<1x8x32xf32>
    %cst_12 = arith.constant 0.000000e+00 : f32
    %64 = vector.broadcast %cst_12 : f32 to vector<1x8x32xf32>
    %65 = arith.maximumf %63, %64 : vector<1x8x32xf32>
    %66 = vector.shape_cast %65 : vector<1x8x32xf32> to vector<8x32xf32>
    %67 = arith.truncf %66 : vector<8x32xf32> to vector<8x32xbf16>
    %c0_13 = arith.constant 0 : index
    %c0_14 = arith.constant 0 : index
    %68 = vector.load %arg6[%c0_13, %c0_14] : memref<32x32xbf16, #tpu.memory_space<vmem>>, vector<32x32xbf16>
    %cst_15 = arith.constant dense<0.000000e+00> : vector<8x32xf32>
    %69 = tpu.matmul %67, %68, %cst_15 {dimension_numbers = #tpu.dot_dimension_numbers<[1], [0], [0], [1], [0, 0, 1, 1], [], []>} : vector<8x32xbf16>, vector<32x32xbf16>, vector<8x32xf32> -> vector<8x32xf32>
    %70 = vector.shape_cast %69 : vector<8x32xf32> to vector<1x8x32xf32>
    %71 = vector.extract_strided_slice %0 {offsets = [0, 0, 0], sizes = [1, 8, 1], strides = [1, 1, 1]} : vector<1x8x8xf32> to vector<1x8x1xf32>
    %72 = vector.extract_strided_slice %70 {offsets = [0, 0, 0], sizes = [1, 1, 32], strides = [1, 1, 1]} : vector<1x8x32xf32> to vector<1x1x32xf32>
    %73 = vector.broadcast %71 : vector<1x8x1xf32> to vector<1x8x32xf32>
    %74 = vector.broadcast %72 : vector<1x1x32xf32> to vector<1x8x32xf32>
    %75 = arith.mulf %73, %74 : vector<1x8x32xf32>
    %76 = vector.extract_strided_slice %0 {offsets = [0, 0, 1], sizes = [1, 8, 1], strides = [1, 1, 1]} : vector<1x8x8xf32> to vector<1x8x1xf32>
    %77 = vector.extract_strided_slice %70 {offsets = [0, 1, 0], sizes = [1, 1, 32], strides = [1, 1, 1]} : vector<1x8x32xf32> to vector<1x1x32xf32>
    %78 = vector.broadcast %76 : vector<1x8x1xf32> to vector<1x8x32xf32>
    %79 = vector.broadcast %77 : vector<1x1x32xf32> to vector<1x8x32xf32>
    %80 = arith.mulf %78, %79 : vector<1x8x32xf32>
    %81 = arith.addf %75, %80 : vector<1x8x32xf32>
    %82 = vector.extract_strided_slice %0 {offsets = [0, 0, 2], sizes = [1, 8, 1], strides = [1, 1, 1]} : vector<1x8x8xf32> to vector<1x8x1xf32>
    %83 = vector.extract_strided_slice %70 {offsets = [0, 2, 0], sizes = [1, 1, 32], strides = [1, 1, 1]} : vector<1x8x32xf32> to vector<1x1x32xf32>
    %84 = vector.broadcast %82 : vector<1x8x1xf32> to vector<1x8x32xf32>
    %85 = vector.broadcast %83 : vector<1x1x32xf32> to vector<1x8x32xf32>
    %86 = arith.mulf %84, %85 : vector<1x8x32xf32>
    %87 = arith.addf %81, %86 : vector<1x8x32xf32>
    %88 = vector.extract_strided_slice %0 {offsets = [0, 0, 3], sizes = [1, 8, 1], strides = [1, 1, 1]} : vector<1x8x8xf32> to vector<1x8x1xf32>
    %89 = vector.extract_strided_slice %70 {offsets = [0, 3, 0], sizes = [1, 1, 32], strides = [1, 1, 1]} : vector<1x8x32xf32> to vector<1x1x32xf32>
    %90 = vector.broadcast %88 : vector<1x8x1xf32> to vector<1x8x32xf32>
    %91 = vector.broadcast %89 : vector<1x1x32xf32> to vector<1x8x32xf32>
    %92 = arith.mulf %90, %91 : vector<1x8x32xf32>
    %93 = arith.addf %87, %92 : vector<1x8x32xf32>
    %94 = vector.extract_strided_slice %0 {offsets = [0, 0, 4], sizes = [1, 8, 1], strides = [1, 1, 1]} : vector<1x8x8xf32> to vector<1x8x1xf32>
    %95 = vector.extract_strided_slice %70 {offsets = [0, 4, 0], sizes = [1, 1, 32], strides = [1, 1, 1]} : vector<1x8x32xf32> to vector<1x1x32xf32>
    %96 = vector.broadcast %94 : vector<1x8x1xf32> to vector<1x8x32xf32>
    %97 = vector.broadcast %95 : vector<1x1x32xf32> to vector<1x8x32xf32>
    %98 = arith.mulf %96, %97 : vector<1x8x32xf32>
    %99 = arith.addf %93, %98 : vector<1x8x32xf32>
    %100 = vector.extract_strided_slice %0 {offsets = [0, 0, 5], sizes = [1, 8, 1], strides = [1, 1, 1]} : vector<1x8x8xf32> to vector<1x8x1xf32>
    %101 = vector.extract_strided_slice %70 {offsets = [0, 5, 0], sizes = [1, 1, 32], strides = [1, 1, 1]} : vector<1x8x32xf32> to vector<1x1x32xf32>
    %102 = vector.broadcast %100 : vector<1x8x1xf32> to vector<1x8x32xf32>
    %103 = vector.broadcast %101 : vector<1x1x32xf32> to vector<1x8x32xf32>
    %104 = arith.mulf %102, %103 : vector<1x8x32xf32>
    %105 = arith.addf %99, %104 : vector<1x8x32xf32>
    %106 = vector.extract_strided_slice %0 {offsets = [0, 0, 6], sizes = [1, 8, 1], strides = [1, 1, 1]} : vector<1x8x8xf32> to vector<1x8x1xf32>
    %107 = vector.extract_strided_slice %70 {offsets = [0, 6, 0], sizes = [1, 1, 32], strides = [1, 1, 1]} : vector<1x8x32xf32> to vector<1x1x32xf32>
    %108 = vector.broadcast %106 : vector<1x8x1xf32> to vector<1x8x32xf32>
    %109 = vector.broadcast %107 : vector<1x1x32xf32> to vector<1x8x32xf32>
    %110 = arith.mulf %108, %109 : vector<1x8x32xf32>
    %111 = arith.addf %105, %110 : vector<1x8x32xf32>
    %112 = vector.extract_strided_slice %0 {offsets = [0, 0, 7], sizes = [1, 8, 1], strides = [1, 1, 1]} : vector<1x8x8xf32> to vector<1x8x1xf32>
    %113 = vector.extract_strided_slice %70 {offsets = [0, 7, 0], sizes = [1, 1, 32], strides = [1, 1, 1]} : vector<1x8x32xf32> to vector<1x1x32xf32>
    %114 = vector.broadcast %112 : vector<1x8x1xf32> to vector<1x8x32xf32>
    %115 = vector.broadcast %113 : vector<1x1x32xf32> to vector<1x8x32xf32>
    %116 = arith.mulf %114, %115 : vector<1x8x32xf32>
    %117 = arith.addf %111, %116 : vector<1x8x32xf32>
    %118 = vector.broadcast %3 : vector<1x8x1xf32> to vector<1x8x32xf32>
    %119 = arith.mulf %117, %118 : vector<1x8x32xf32>
    %c0_16 = arith.constant 0 : index
    %c0_17 = arith.constant 0 : index
    %120 = vector.load %arg7[%c0_16, %c0_17] : memref<1x32xf32, #tpu.memory_space<vmem>>, vector<1x32xf32>
    %121 = vector.shape_cast %120 : vector<1x32xf32> to vector<1x1x32xf32>
    %122 = vector.broadcast %121 : vector<1x1x32xf32> to vector<1x8x32xf32>
    %123 = arith.addf %119, %122 : vector<1x8x32xf32>
    %cst_18 = arith.constant 0.000000e+00 : f32
    %124 = vector.broadcast %cst_18 : f32 to vector<1x8x32xf32>
    %125 = arith.maximumf %123, %124 : vector<1x8x32xf32>
    %126 = vector.broadcast %4 : vector<1x8x1xf32> to vector<1x8x32xf32>
    %127 = arith.mulf %125, %126 : vector<1x8x32xf32>
    %128 = vector.shape_cast %127 : vector<1x8x32xf32> to vector<1x1x256xf32>
    %c0_19 = arith.constant 0 : index
    %c0_20 = arith.constant 0 : index
    %c0_21 = arith.constant 0 : index
    %129 = vector.load %arg8[%c0_19, %c0_20, %c0_21] : memref<1x1x256xf32, #tpu.memory_space<vmem>>, vector<1x1x256xf32>
    tpu.vector_store %arg8[%c0_19, %c0_20, %c0_21], %128 {strides = array<i32>} : memref<1x1x256xf32, #tpu.memory_space<vmem>>, vector<1x1x256xf32>,
    return
  }
  func.func @transform_0(%arg0: i32) -> (i32, i32, i32) {
    %c0_i32 = arith.constant 0 : i32
    %c0_i32_0 = arith.constant 0 : i32
    %c0_i32_1 = arith.constant 0 : i32
    return %arg0, %c0_i32, %c0_i32_0 : i32, i32, i32
  }
  func.func @transform_1(%arg0: i32) -> (i32, i32, i32) {
    %c0_i32 = arith.constant 0 : i32
    %c0_i32_0 = arith.constant 0 : i32
    %c0_i32_1 = arith.constant 0 : i32
    return %arg0, %c0_i32, %c0_i32_0 : i32, i32, i32
  }
  func.func @transform_2(%arg0: i32) -> (i32, i32, i32) {
    %c0_i32 = arith.constant 0 : i32
    %c0_i32_0 = arith.constant 0 : i32
    %c0_i32_1 = arith.constant 0 : i32
    return %arg0, %c0_i32, %c0_i32_0 : i32, i32, i32
  }
  func.func @transform_3(%arg0: i32) -> (i32, i32) {
    %c0_i32 = arith.constant 0 : i32
    %c0_i32_0 = arith.constant 0 : i32
    %c0_i32_1 = arith.constant 0 : i32
    return %c0_i32, %c0_i32_0 : i32, i32
  }
  func.func @transform_4(%arg0: i32) -> (i32, i32) {
    %c0_i32 = arith.constant 0 : i32
    %c0_i32_0 = arith.constant 0 : i32
    %c0_i32_1 = arith.constant 0 : i32
    return %c0_i32, %c0_i32_0 : i32, i32
  }
  func.func @transform_5(%arg0: i32) -> (i32, i32) {
    %c0_i32 = arith.constant 0 : i32
    %c0_i32_0 = arith.constant 0 : i32
    %c0_i32_1 = arith.constant 0 : i32
    return %c0_i32, %c0_i32_0 : i32, i32
  }
  func.func @transform_6(%arg0: i32) -> (i32, i32) {
    %c0_i32 = arith.constant 0 : i32
    %c0_i32_0 = arith.constant 0 : i32
    %c0_i32_1 = arith.constant 0 : i32
    return %c0_i32, %c0_i32_0 : i32, i32
  }
  func.func @transform_7(%arg0: i32) -> (i32, i32, i32) {
    %c0_i32 = arith.constant 0 : i32
    %c0_i32_0 = arith.constant 0 : i32
    %c0_i32_1 = arith.constant 0 : i32
    return %arg0, %c0_i32, %c0_i32_0 : i32, i32, i32
  }
}

</mosaic_0001>

<bundles_post_ra>
// kernel: tpu_custom_call.1
= control target key start
LH: loop header
LB: loop body
LE: loop exit
PB: predicated region body
PF: predicated region fallthrough
CT: control target
= control target key end

     0   :  { %s1453_s0 = inlined_call_operand.vmem [shape: f32[2,8,32], index: 0, kind: input, shape index: {}]   ;;  %s1454_s1 = inlined_call_operand.hbm [shape: f32[2,8,8], index: 1, kind: input, shape index: {}]   ;;  %s1455_s2 = inlined_call_operand.vmem [shape: f32[2,8,2], index: 2, kind: input, shape index: {}]   ;;  %s1456_s3 = inlined_call_operand.hbm [shape: bf16[32,32], index: 3, kind: input, shape index: {}]   ;;  %s1457_s4 = inlined_call_operand.vmem [shape: f32[1,32], index: 4, kind: input, shape index: {}]   ;;  %s1458_s5 = inlined_call_operand.hbm [shape: bf16[32,32], index: 5, kind: input, shape index: {}]   ;;  %s1459_s6 = inlined_call_operand.vmem [shape: f32[1,32], index: 6, kind: input, shape index: {}]   ;;  %s1460_s7 = inlined_call_operand.hbm [shape: f32[2,1,256], index: 7, kind: output, shape index: {}]  }
   0x1   :  { %1465 = sst [smem:[#allocation12_spill]] %s1456_s3 }
   0x2   :  { %1466 = sst [smem:[#allocation13_spill]] %s1458_s5 }
   0x3   :  { %12 = vsyncpa [#allocation3], 0 }
   0x4   :  { %14 = vsyncpa [#allocation3 + $0x1], 0 }
   0x5   :  { %15 = vsyncpa [#allocation6], 0 }
   0x6   :  { %16 = vsyncpa [#allocation4], 0 }
   0x7   :  { %18 = vsyncpa [#allocation4 + $0x1], 0  ;;  %s1237_s24 = smov 0   ;;  %s1239_s25 = smov 0  }
   0x8   :  { %s1241_s26 = smov 0   ;;  %s1243_s27 = smov 0  }
   0x9 LB: > { %s1258_s28 = sadd.s32 4294967295, %s1173_s27   ;;  %s873_s29 = sadd.s32 4294967294, %s1173_s27   ;;  %s1173_s27 = sphi %s1243_s27, %s1486_s27   ;;  %s1169_s26 = sphi %s1241_s26, %s1485_s26   ;;  %s1165_s25 = sphi %s1239_s25, %s1484_s25   ;;  %s1161_s24 = sphi %s1237_s24, %s1483_s24  }
   0xa   : > { %p70_p0 = scmp.ne.s32.totalorder %s1165_s25, %s1161_s24  ;;  %p1461_p1 = scmp.eq.s32.totalorder %s1258_s28, 0 }
   0xb   : > { %p210_p3 = scmp.eq.s32.totalorder %s873_s29, 1  ;;  %p874_p5 = scmp.ge.s32.totalorder %s1173_s27, 1 }
   0xc   : > { %p1267_p4 = por %p1461_p1, %p70_p0  ;;  %p217_p7 = scmp.lt.s32.totalorder %s1173_s27, 3 }
   0xd   : > { %p1272_p6 = por %p210_p3, %p70_p0  ;;  %s1175_s10 = smov [#allocation5]  }
   0xe   : > { %s1467_s30 = scalar_select %p1267_p4, 1, 0 }
   0xf   : > { %s1468_s8 = scalar_select %p1272_p6, 1, 0 }
  0x10   : > { %p1277_p8 = pnand %p874_p5, %p217_p7  ;;  %s229_s11 = sshll.u32 %s1175_s10, 4  ;;  %s230_s11 = int_to_ptr.vmem [resolvable:$true] %s229_s11 }
  0x11   : > { %s1176_s13 = smov [#allocation7]   ;;  %s1036_s15 = scalar_lea.vmem %s230_s11, 256 }
  0x12   : > { %s1469_s9 = scalar_select %p1277_p8, 1, 0 }
  0x13   : > { %p935_p9 = pneg %p1277_p8  ;;  %s245_s14 = sshll.u32 %s1176_s13, 4  ;;  %s246_s14 = int_to_ptr.vmem [resolvable:$true] %s245_s14 }
  0x14   : > { %p1037_p13 = scmp.ne.s32.totalorder %s230_s11, %s1036_s15  ;;  %p1044_p5 = scmp.lt.s32.totalorder %s230_s11, %s230_s11 }
  0x15   : > { %p1286_p11 = pnand %p935_p9, %p1461_p1  ;;  %p1045_p7 = scmp.lt.s32.totalorder %s1036_s15, %s1036_s15 }
  0x17   : > { %p1027_p12 = pneg %p1286_p11  ;;  %p1046_p10 = por %p1045_p7, %p1044_p5 }
  0x19   : > { %p1039_p0 = pnand %p1037_p13, %p1027_p12 }
  0x1b   : > { %p1040_p3 = pneg %p1039_p0 }
  0x1d   : > { %p1047_p9 = pnand %p1046_p10, %p1040_p3 }
  0x1f   : > { %1050 = shalt.err (!%p1047_p9)
}
  0x20   : > { %s1177_s16 = smov 64   ;;  %s1178_s17 = smov 4  }
  0x21   : > { %s1471_s3 = sld [smem:[#allocation12_spill]]  ;;  %s1062_s20 = scalar_lea.vmem %s246_s14, 256 }
  0x22   : > { %p1063_p1 = scmp.ne.s32.totalorder %s246_s14, %s1062_s20  ;;  %p1070_p2 = scmp.lt.s32.totalorder %s246_s14, %s246_s14 }
  0x23   : > { %p1071_p6 = scmp.lt.s32.totalorder %s1062_s20, %s1062_s20 }
  0x24   : > { %p1065_p13 = pnand %p1063_p1, %p1027_p12 }
  0x25   : > { %p1072_p5 = por %p1071_p6, %p1070_p2 }
  0x26   : > { %p1066_p0 = pneg %p1065_p13 }
  0x27   : > { %938 = dma.hbm_to_vmem [thread:$0]  (!%p1286_p11), %s1471_s3, 256, %s230_s11, [#allocation6], %s1177_s16, %s1177_s16, %s1178_s17  }
  0x28   : > { %p1073_p10 = pnand %p1072_p5, %p1066_p0 }
  0x2a   : > { %1076 = shalt.err (!%p1073_p10)
}
  0x2b   : > { %s1472_s5 = sld [smem:[#allocation13_spill]]  ;;  %s1309_s23 = sadd.s32 1, %s1173_s27  }
  0x2c   : > { %s57_s29 = sadd.s32 1, %s1169_s26  ;;  %s54_s10 = ssub.s32 %s1173_s27, %s1309_s23 }
  0x2d   : > { %p64_p1 = scmp.ne.s32.totalorder %s1169_s26, %s1165_s25  ;;  %p55_p2 = scmp.eq.s32.totalorder %s54_s10, 0 }
  0x2e   : > { %p65_p6 = scmp.eq.s32.totalorder %s1173_s27, 0  ;;  %p1473_p12 = scmp.eq.s32.totalorder %s1258_s28, 1 }
  0x2f   : > { %p952_p7 = scmp.lt.s32.totalorder %s1173_s27, 2  ;;  %s269_s13 = sand.u32 1, %s1169_s26  }
  0x30   : > { %p1319_p3 = por %p1473_p12, %p64_p1  ;;  %p66_p9 = por %p65_p6, %p64_p1 }
  0x31   : > { %941 = dma.hbm_to_vmem [thread:$0]  (!%p1286_p11), %s1472_s5, 256, %s246_s14, [#allocation6], %s1177_s16, %s1177_s16, %s1178_s17  }
  0x32   : > { %s1474_s11 = scalar_select %p1319_p3, 1, 0 }
  0x33   : > { %s1325_s12 = scalar_select %p55_p2, %s1169_s26, %s57_s29  }
  0x34   : > { %s878_s15 = sshll.u32 %s269_s13, 3  ;;  %s879_s14 = sshll.u32 %s1173_s27, 7 }
  0x35   : > { %s1332_s18 = scalar_lea.hbm %s1454_s1, %s879_s14  ;;  %s273_s19 = scalar_lea.vmem [#allocation2], %s878_s15 }
  0x36   : > { %s280_s20 = sshll.u32 %s273_s19, 4  ;;  %p1334_p11 = pnand %p952_p7, %p66_p9  ;;  %s281_s20 = int_to_ptr.vmem [resolvable:$true] %s280_s20 }
  0x37   : > { %s270_s22 = scalar_lea.sflag [#allocation3], %s269_s13  ;;  %s1077_s29 = scalar_lea.hbm %s1332_s18, 128 }
  0x38   : > { %p1078_p13 = scmp.ne.s32.totalorder %s1332_s18, %s1077_s29  ;;  %p1079_p0 = pneg %p1334_p11 }
  0x39   : > { %s1082_s16 = scalar_lea.hbm %s1454_s1, 256  ;;  %p1083_p1 = scmp.lt.s32.totalorder %s1332_s18, %s1454_s1 }
  0x3a   : > { %p1080_p5 = pnand %p1079_p0, %p1078_p13  ;;  %p1084_p2 = scmp.lt.s32.totalorder %s1082_s16, %s1077_s29 }
  0x3c   : > { %p1081_p10 = pneg %p1080_p5  ;;  %p1085_p6 = por %p1084_p2, %p1083_p1 }
  0x3e   : > { %p1086_p12 = pnand %p1085_p6, %p1081_p10 }
  0x40   : > { %1089 = shalt.err (!%p1086_p12)
}
  0x41   : > { %s1090_s19 = scalar_lea.vmem %s281_s20, 128  ;;  %s1179_s13 = smov [#allocation2]  }
  0x42   : > { %p1091_p7 = scmp.ne.s32.totalorder %s281_s20, %s1090_s19  ;;  %s1095_s3 = sshll.u32 %s1179_s13, 4  ;;  %s1096_s3 = int_to_ptr.vmem [resolvable:$false] %s1095_s3 }
  0x43   : > { %s1097_s5 = scalar_lea.vmem %s1096_s3, 256  ;;  %p1098_p13 = scmp.lt.s32.totalorder %s281_s20, %s1096_s3 }
  0x44   : > { %p1093_p9 = pnand %p1091_p7, %p1079_p0  ;;  %p1099_p5 = scmp.lt.s32.totalorder %s1097_s5, %s1090_s19 }
  0x46   : > { %p1094_p3 = pneg %p1093_p9  ;;  %p1100_p4 = por %p1099_p5, %p1098_p13 }
  0x48   : > { %p1101_p8 = pnand %p1100_p4, %p1094_p3 }
  0x4a   : > { %1104 = shalt.err (!%p1101_p8)
}
  0x4b   : > { %945 = dma.hbm_to_vmem [thread:$0]  (!%p1334_p11), %s1332_s18, 128, %s281_s20, %s270_s22  }
  0x4c   : > { %p1476_p10 = scmp.ne.s32.totalorder %s1469_s9, 0 }
  0x4d   : > { %s1355_s29 = sand.u32 (!%p1476_p10), 1, %s1165_s25   ;;  %p1477_p0 = scmp.ne.s32.totalorder (!%p1476_p10), %s1467_s30, 0 }
  0x4e   : > { %296 = sbr.rel (%p1476_p10) target bundleno = 687 (0x2af), region = 48  ;;  %s881_s10 = sshll.u32 (!%p1476_p10), %s1355_s29, 3 }
  0x4f   : > { %s299_s14 = scalar_lea.sflag (!%p1476_p10), [#allocation3], %s1355_s29  ;;  %s302_s3 = scalar_lea.vmem (!%p1476_p10), [#allocation2], %s881_s10 }
  0x53   : > { %1148 = dma.done.wait (%p1477_p0), %s299_s14, 128  }
  0x54   : > { %1150 = vsyncadd (%p1477_p0), %s299_s14, 4294967168  ;;  %p1478_p4 = scmp.eq.s32.totalorder %s1258_s28, 0 }
  0x56   : > { %1152 = dma.done.wait (%p1478_p4), [#allocation6], 512   ;;  %p1479_p8 = pmov %p1478_p4 }
  0x57   : > { %p349_p3 = scmp.lt.s32.totalorder %s1258_s28, 1  ;;  %v1180_v0 = vmov 0.0   ;;  %vm1181_vm0 = vmmov 0   ;;  %v1182_v1 = vmov 2   ;;  %v1183_v2 = vmov 0   ;;  %v1019_v3 = vld [vmem:[#allocation5 + $0x8] sm:$0xff]  }
  0x58   : > { %1154 = vsyncadd (%p1479_p8), [#allocation6], 4294966784  ;;  %907 = vmatprep.subr.bf16.mxu0 %v1180_v0  ;;  %911 = vmatprep.mubr.msk.bf16.mxu0 %vm1181_vm0, %v1180_v0  ;;  %v1020_v4 = vld [vmem:[#allocation5] sm:$0xff]   ;;  %v358_v7 = vld [vmem:[%s302_s3] sm:$0xff]  ;;  %vm379_vm1 = vcmask 261120   ;;  %v1184_v9 = vmov 3   ;;  %v428_v19 = vlaneseq }
  0x59   : > { %s350_s5 = scalar_select %p349_p3, %s1258_s28, 1  ;;  %1010 = vset.pattern.permute.xlu1 %v1182_v1  ;;  %1008 = vset.pattern.permute.xlu0 %v1183_v2  ;;  %v1185_v10 = vmov 1   ;;  %v1186_v11 = vmov 4   ;;  %v1187_v12 = vmov 5   ;;  %v1188_v14 = vmov 6   ;;  %v1021_v16 = vld [vmem:[#allocation7 + $0x8] sm:$0xff]  }
  0x5a   : > { %915 = vmatprep.subr.bf16.mxu1 %v1180_v0  ;;  %919 = vmatprep.mubr.msk.bf16.mxu1 %vm1181_vm0, %v1180_v0  ;;  %v1189_v15 = vmov 7   ;;  %v1022_v17 = vld [vmem:[#allocation7] sm:$0xff]   ;;  %v1383_v20 = vshrl.u32 %v428_v19, 7  ;;  %s1192_s10 = smov 32   ;;  %s1193_s14 = smov 64   ;;  %vm715_vm2 = vcmask 523264  }
  0x5b   : > { %s885_s30 = sshll.u32 %s350_s5, 3  ;;  %908 = vmatpush3.bf16.msra.mxu0 %v1019_v3  ;;  %444 = vperm.xlu1 %1010, %v358_v7   ;;  %v890_v1 = vld [vmem:[%s1457_s4] ss:$0 sm:$0xff]  ;;  %s1194_s3 = smov 96   ;;  %vm717_vm3 = vcmask 785408   ;;  %vm742_vm4 = vcmp.lt.s32.totalorder %v428_v19, 256 }
  0x5c   : > { %s352_s20 = scalar_lea.vmem %s1453_s0, %s885_s30  ;;  %s356_s16 = scalar_lea.vmem %s1455_s2, %s885_s30  ;;  %909 = vmatprep.subr.bf16.mxu0 %v1180_v0  ;;  %425 = vperm.xlu0 %1008, %v358_v7   ;;  %v430_v23 = vsub.s32 0, %v1383_v20  ;;  %v439_v24 = vsub.s32 1, %v1383_v20  ;;  %v449_v25 = vsub.s32 2, %v1383_v20  ;;  %v459_v26 = vsub.s32 3, %v1383_v20 }
  0x5d   : > { %v359_v5 = vld [vmem:[%s356_s16] sm:$0xff]  ;;  %916 = vmatpush3.bf16.msra.mxu1 %v1021_v16  ;;  %v469_v32 = vsub.s32 4, %v1383_v20  ;;  %v479_v38 = vsub.s32 5, %v1383_v20  ;;  %v489_v43 = vsub.s32 6, %v1383_v20  ;;  %v499_v46 = vsub.s32 7, %v1383_v20  ;;  %s884_s5 = sshll.u32 %s1355_s29, 1 }
  0x5e   : > { %v361_v6 = vld [vmem:[%s352_s20] sm:$0xff]  ;;  %1023 = vrcp.f32 %v359_v5  ;;  %917 = vmatprep.subr.bf16.mxu1 %v1180_v0  ;;  %s900_s30 = sshll.u32 %s1258_s28, 5  ;;  %s348_s9 = scalar_lea.vmem [#allocation8], %s884_s5 }
  0x5f   : > { %v362_v8 = vpack.c.bf16 %v361_v6, %v361_v6  ;;  %910 = vmatpush3.bf16.msra.mxu0 %v1020_v4  ;;  %1011 = vset.pattern.permute.xlu1 %v1184_v9  ;;  %s760_s18 = sshll.u32 %s348_s9, 4  ;;  %s758_s22 = scalar_lea.hbm %s1460_s7, %s900_s30  ;;  %s761_s18 = int_to_ptr.vmem [resolvable:$true] %s760_s18 }
  0x60   : > { %454 = vperm.xlu1 %1011, %v358_v7   ;;  %1009 = vset.pattern.permute.xlu0 %v1185_v10  ;;  %s746_s16 = scalar_lea.sflag [#allocation4], %s1355_s29  ;;  %s1105_s17 = scalar_lea.vmem %s761_s18, 32 }
  0x61   : > { %434 = vperm.xlu0 %1009, %v358_v7   ;;  %918 = vmatpush3.bf16.msra.mxu1 %v1022_v17  ;;  %p1106_p11 = scmp.ne.s32.totalorder %s761_s18, %s1105_s17  ;;  %p1480_p1 = scmp.ne.s32.totalorder %s1474_s11, 0 }
  0x62   : > { %912 = vmatmul.mubr.msk.bf16.vlgmr.msra.gmra.mxu0 %vm379_vm1, %v362_v8  ;;  %s1196_s15 = smov [#allocation8]  }
  0x63   : > { %p1107_p2 = pnand %p1106_p11, %p1480_p1  ;;  %s1109_s28 = sshll.u32 %s1196_s15, 4  ;;  %s1110_s28 = int_to_ptr.vmem [resolvable:$false] %s1109_s28 }
  0x64   : > { %1012 = vset.pattern.permute.xlu1 %v1186_v11  ;;  %s1111_s19 = scalar_lea.vmem %s1110_s28, 64  ;;  %p1112_p12 = scmp.lt.s32.totalorder %s761_s18, %s1110_s28 }
  0x65   : > { %464 = vperm.xlu1 %1012, %v358_v7   ;;  %1013 = vset.pattern.permute.xlu0 %v1187_v12  ;;  %p1108_p6 = pneg %p1107_p2  ;;  %p1113_p7 = scmp.lt.s32.totalorder %s1111_s19, %s1105_s17 }
  0x66   : > { %474 = vperm.xlu0 %1013, %v358_v7  }
  0x67   : > { %p1114_p9 = por %p1113_p7, %p1112_p12 }
  0x69   : > { %1014 = vset.pattern.permute.xlu1 %v1188_v14  ;;  %p1115_p13 = pnand %p1114_p9, %p1108_p6 }
  0x6a   : > { %484 = vperm.xlu1 %1014, %v358_v7   ;;  %1016 = vset.pattern.permute.xlu0 %v1183_v2 }
  0x6b   : > { %v1024_v13 = vpop.eup %1023 }
  0x6c   : > { %505 = vperm.xlu0 %1016, %v1024_v13  }
  0x6e   : > { %1015 = vset.pattern.permute.xlu1 %v1189_v15 }
  0x6f   : > { %494 = vperm.xlu1 %1015, %v358_v7  }
  0x70   : > { %1018 = vset.pattern.permute.xlu0 %v1185_v10 }
  0x73   : > { %1017 = vset.pattern.permute.xlu1 %v1185_v10 }
  0x74   : > { %637 = vperm.xlu1 %1017, %v359_v5  }
  0xd6   : > { %v445_v18 = vpop.permute.xlu1 %444 }
  0xd7   : > { %v426_v22 = vpop.permute.xlu0 %425 }
  0xdb   : > { %v1385_v21 = vpop.permute.xlu1 %454 }
  0xdc   : > { %v435_v33 = vpop.permute.xlu0 %434 }
  0xe0   : > { %v465_v27 = vpop.permute.xlu1 %464 }
  0xe1   : > { %v475_v50 = vpop.permute.xlu0 %474 }
  0xe5   : > { %v485_v44 = vpop.permute.xlu1 %484 }
  0xe7   : > { %v506_v62 = vpop.permute.xlu0 %505 }
  0xea   : > { %v495_v57 = vpop.permute.xlu1 %494 }
 0x122   : > { %v417_v28 = vpop.f32.mrf.mxu0 }
 0x123   : > { %v431_v29 = vrot.slane %v417_v28, %v430_v23  ;;  %v440_v30 = vrot.slane %v417_v28, %v439_v24  ;;  %v450_v31 = vrot.slane %v417_v28, %v449_v25  ;;  %v460_v37 = vrot.slane %v417_v28, %v459_v26 }
 0x124   : > { %v913_v34 = vpop.f32.mrf.mxu0  ;;  %v470_v42 = vrot.slane %v417_v28, %v469_v32  ;;  %v480_v49 = vrot.slane %v417_v28, %v479_v38  ;;  %v490_v53 = vrot.slane %v417_v28, %v489_v43  ;;  %v500_v54 = vrot.slane %v417_v28, %v499_v46 }
 0x125   : > { %v432_v35 = vmul.f32 %v431_v29, %v426_v22  ;;  %v441_v36 = vmul.f32 %v440_v30, %v435_v33  ;;  %v451_v41 = vmul.f32 %v450_v31, %v445_v18  ;;  %v461_v48 = vmul.f32 %v460_v37, %v1385_v21 }
 0x126   : > { %v420_v39 = vpop.f32.mrf.mxu0  ;;  %v471_v52 = vmul.f32 %v470_v42, %v465_v27  ;;  %v481_v56 = vmul.f32 %v480_v49, %v475_v50  ;;  %v491_v59 = vmul.f32 %v490_v53, %v485_v44  ;;  %v501_v60 = vmul.f32 %v500_v54, %v495_v57 }
 0x127   : > { %v442_v40 = vadd.f32 %v441_v36, %v432_v35 }
 0x128   : > { %v914_v45 = vpop.f32.mrf.mxu0 }
 0x129   : > { %v452_v47 = vadd.f32 %v451_v41, %v442_v40  ;;  %v1191_v41 = vmov 1934713408   ;;  %v638_v45 = vpop.permute.xlu1 %637 }
 0x12b   : > { %v462_v51 = vadd.f32 %v461_v48, %v452_v47 }
 0x12d   : > { %v472_v55 = vadd.f32 %v471_v52, %v462_v51 }
 0x12f   : > { %v482_v58 = vadd.f32 %v481_v56, %v472_v55 }
 0x131   : > { %v492_v61 = vadd.f32 %v491_v59, %v482_v58 }
 0x133   : > { %v502_v63 = vadd.f32 %v501_v60, %v492_v61 }
 0x135   : > { %v508_v2 = vmul.f32 %v506_v62, %v502_v63 }
 0x137   : > { %v516_v3 = vadd.f32 %v890_v1, %v508_v2  ;;  %v1195_v1 = vmov 1966171168  }
 0x138   : > { %v726_v2 = vunpack.c.l.s4 %v1195_v1 }
 0x139   : > { %v517_v4 = vmax.f32 %v516_v3, 0.0 }
 0x13b   : > { %v518_v5 = vpack.c.bf16 %v517_v4, %v517_v4 }
 0x13d   : > { %920 = vmatmul.mubr.msk.bf16.vlgmr.msra.gmra.mxu1 %vm379_vm1, %v518_v5  ;;  %v727_v5 = vunpack.c.0.s8 %v726_v2 }
 0x1fd   : > { %v572_v6 = vpop.f32.mrf.mxu1 }
 0x1fe   : > { %v581_v7 = vrot.slane %v572_v6, %v430_v23  ;;  %v586_v8 = vrot.slane %v572_v6, %v439_v24  ;;  %v592_v9 = vrot.slane %v572_v6, %v449_v25  ;;  %v598_v13 = vrot.slane %v572_v6, %v459_v26 }
 0x1ff   : > { %v921_v10 = vpop.f32.mrf.mxu1  ;;  %v604_v17 = vrot.slane %v572_v6, %v469_v32  ;;  %v610_v31 = vrot.slane %v572_v6, %v479_v38  ;;  %v616_v36 = vrot.slane %v572_v6, %v489_v43  ;;  %v622_v24 = vrot.slane %v572_v6, %v499_v46 }
 0x200   : > { %v582_v11 = vmul.f32 %v581_v7, %v426_v22  ;;  %v587_v12 = vmul.f32 %v586_v8, %v435_v33  ;;  %v593_v16 = vmul.f32 %v592_v9, %v445_v18  ;;  %v599_v30 = vmul.f32 %v598_v13, %v1385_v21  ;;  %v894_v21 = vld [vmem:[%s1459_s6] ss:$0 sm:$0xff] }
 0x201   : > { %v575_v14 = vpop.f32.mrf.mxu1  ;;  %v605_v35 = vmul.f32 %v604_v17, %v465_v27  ;;  %v611_v23 = vmul.f32 %v610_v31, %v475_v50  ;;  %v617_v39 = vmul.f32 %v616_v36, %v485_v44  ;;  %v1190_v22 = vmov 1983009808  }
 0x202   : > { %v588_v15 = vadd.f32 %v587_v12, %v582_v11  ;;  %v643_v33 = vunpack.c.l.s4 %v1190_v22  ;;  %v623_v40 = vmul.f32 %v622_v24, %v495_v57  ;;  %v658_v18 = vunpack.c.l.s4 %v1191_v41 }
 0x203   : > { %v922_v28 = vpop.f32.mrf.mxu1  ;;  %v730_v10 = vsub.s32 %v727_v5, %v1383_v20 }
 0x204   : > { %v594_v29 = vadd.f32 %v593_v16, %v588_v15  ;;  %v644_v38 = vunpack.c.0.s8 %v643_v33  ;;  %v659_v27 = vunpack.c.0.s8 %v658_v18 }
 0x206   : > { %v600_v34 = vadd.f32 %v599_v30, %v594_v29  ;;  %v647_v46 = vsub.s32 %v644_v38, %v1383_v20  ;;  %v662_v44 = vsub.s32 %v659_v27, %v1383_v20 }
 0x208   : > { %v606_v37 = vadd.f32 %v605_v35, %v600_v34 }
 0x20a   : > { %v612_v25 = vadd.f32 %v611_v23, %v606_v37 }
 0x20c   : > { %v618_v26 = vadd.f32 %v617_v39, %v612_v25 }
 0x20e   : > { %v624_v32 = vadd.f32 %v623_v40, %v618_v26 }
 0x210   : > { %v625_v42 = vmul.f32 %v624_v32, %v506_v62 }
 0x212   : > { %v633_v43 = vadd.f32 %v894_v21, %v625_v42 }
 0x214   : > { %v634_v47 = vmax.f32 %v633_v43, 0.0 }
 0x216   : > { %v640_v48 = vmul.f32 %v638_v45, %v634_v47 }
 0x218   : > { %v641_v49 = vcombine.high %v640_v48, %v1180_v0  ;;  %v648_v50 = vrot.slane %v640_v48, %v647_v46 }
 0x21a   : > { %v655_v51 = vrot.slane %v641_v49, %v647_v46  ;;  %v663_v52 = vrot.slane %v648_v50, %v662_v44  ;;  %v656_v53 = vcombine.high %v648_v50, %v1180_v0 }
 0x21c   : > { %v686_v54 = vcombine.high %v663_v52, %v1180_v0  ;;  %v678_v55 = vrot.slane %v655_v51, %v662_v44  ;;  %v671_v57 = vcombine.high %v655_v51, %v1180_v0  ;;  %v670_v58 = vrot.slane %v656_v53, %v662_v44 }
 0x21e   : > { %691 = vrot.lane.b32.xlu1 %v686_v54, %s1192_s10  ;;  %v688_v56 = vcombine.high %v678_v55, %v1180_v0  ;;  %v685_v59 = vrot.slane %v671_v57, %v662_v44  ;;  %v687_v60 = vcombine.high %v670_v58, %v1180_v0 }
 0x220   : > { %703 = vrot.lane.b32.xlu0 %v688_v56, %s1192_s10  ;;  %v689_v61 = vcombine.high %v685_v59, %v1180_v0 }
 0x222   : > { %695 = vrot.lane.b32.xlu1 %v670_v58, %s1193_s14 }
 0x224   : > { %707 = vrot.lane.b32.xlu0 %v685_v59, %s1193_s14 }
 0x226   : > { %699 = vrot.lane.b32.xlu1 %v687_v60, %s1194_s3 }
 0x228   : > { %711 = vrot.lane.b32.xlu0 %v689_v61, %s1194_s3 }
 0x290   : > { %v692_v62 = vpop.permute.xlu1 %691 }
 0x291   : > { %v714_v7 = vsel %vm379_vm1, %v663_v52, %v692_v62 }
 0x292   : > { %v704_v63 = vpop.permute.xlu0 %703 }
 0x293   : > { %v719_v8 = vsel %vm379_vm1, %v678_v55, %v704_v63 }
 0x294   : > { %v696_v3 = vpop.permute.xlu1 %695 }
 0x295   : > { %v716_v9 = vsel %vm715_vm2, %v714_v7, %v696_v3 }
 0x296   : > { %v708_v4 = vpop.permute.xlu0 %707 }
 0x297   : > { %v720_v0 = vsel %vm715_vm2, %v719_v8, %v708_v4 }
 0x298   : > { %v700_v6 = vpop.permute.xlu1 %699 }
 0x299   : > { %v718_v12 = vsel %vm717_vm3, %v716_v9, %v700_v6 }
 0x29a   : > { %v712_v11 = vpop.permute.xlu0 %711 }
 0x29b   : > { %v721_v13 = vsel %vm717_vm3, %v720_v0, %v712_v11 }
 0x29c   : > { %v724_v14 = vcombine.low %v718_v12, %v721_v13 }
 0x29e   : > { %v731_v15 = vrot.slane %v724_v14, %v730_v10 }
 0x2a0   : > { %v738_v16 = vrot.slane %v731_v15, %v730_v10 }
 0x2a2   : > { %744 = vst.msk [vmem:[%s348_s9] sm:$0x3] %vm742_vm4, %v738_v16 }
 0x2a3   : > { %1118 = shalt.err (!%p1115_p13)
}
 0x2a4   : > { %s1119_s13 = scalar_lea.hbm %s758_s22, 32  ;;  %s1123_s14 = scalar_lea.hbm %s1460_s7, 64 }
 0x2a5   : > { %p1120_p5 = scmp.ne.s32.totalorder %s758_s22, %s1119_s13  ;;  %p1124_p4 = scmp.lt.s32.totalorder %s758_s22, %s1460_s7 }
 0x2a6   : > { %p1125_p8 = scmp.lt.s32.totalorder %s1123_s14, %s1119_s13 }
 0x2a7   : > { %p1121_p10 = pnand %p1120_p5, %p1480_p1 }
 0x2a8   : > { %p1126_p3 = por %p1125_p8, %p1124_p4 }
 0x2a9   : > { %p1122_p0 = pneg %p1121_p10 }
 0x2ab   : > { %p1127_p11 = pnand %p1126_p3, %p1122_p0 }
 0x2ad   : > { %1130 = shalt.err (!%p1127_p11)
}
 0x2ae   : > { %933 = dma.vmem_to_hbm [thread:$0]  (%p1480_p1), %s761_s18, 32, %s758_s22, %s746_s16  }
 0x2af PF: > { %s772_s30 = sand.u32 1, %s1161_s24   ;;  %p1481_p2 = scmp.ne.s32.totalorder %s1468_s8, 0 }
 0x2b0   : > { %p1482_p6 = scmp.ge.s32.totalorder %s1173_s27, 2  ;;  %s773_s9 = scalar_lea.sflag [#allocation4], %s772_s30 }
 0x2b2   : > { %p947_p12 = pnand %p1482_p6, %p1481_p2 }
 0x2b4   : > { %p948_p7 = pneg %p947_p12 }
 0x2b6   : > { %1156 = dma.done.wait (%p948_p7), %s773_s9, 32  }
 0x2b7   : > { %1158 = vsyncadd (%p948_p7), %s773_s9, 4294967264  ;;  %p21_p9 = scmp.ge.s32.totalorder %s1309_s23, 4   ;;  %s1483_s24 = smov %s1165_s25 }
 0x2b8   : > { %s1484_s25 = smov %s1169_s26  ;;  %s1485_s26 = smov %s1325_s12 }
 0x2b9   : > { %s1486_s27 = smov %s1309_s23  ;;  %23 = sbr.rel (!%p21_p9) target bundleno = 9 (0x9), region = 107 }
 0x2be   :  { %778 = vsyncpa [#allocation3], 1 }
 0x2bf   :  { %780 = vsyncpa [#allocation3 + $0x1], 1 }
 0x2c0   :  { %781 = vsyncpa [#allocation6], 1 }
 0x2c1   :  { %782 = vsyncpa [#allocation4], 1 }
 0x2c2   :  { %784 = vsyncpa [#allocation4 + $0x1], 1 }

</bundles_post_ra>
